<compile_context>
chip_gen: v7x
topology: tpu7x:2x2x1
jax: 0.10.0
libtpu: 0.0.40
codegen_flags: <defaults>
</compile_context>

<pallas_src>
import jax
import jax.numpy as jnp
from jax.experimental import pallas as pl
from jax.experimental.pallas import tpu as pltpu


def fcnet_kernel(x_ref, w1_ref, b1_ref, w2_ref, b2_ref, out_ref):
    # fc1: (TB, In) @ (In, H) -> fp32 accumulate on the MXU (bf16 operands).
    x = x_ref[...].astype(jnp.bfloat16)
    w1 = w1_ref[...].astype(jnp.bfloat16)
    h = jnp.dot(x, w1, preferred_element_type=jnp.float32)
    # bias + ReLU in fp32 (VPU, free under the MXU/DMA slots).
    h = jnp.maximum(h + b1_ref[...], 0.0)
    # fc2: (TB, H) @ (H, OutPadded) -> fp32 accumulate.
    w2 = w2_ref[...].astype(jnp.bfloat16)
    y = jnp.dot(h.astype(jnp.bfloat16), w2, preferred_element_type=jnp.float32)
    # Lane-dense (OutPadded % 128 == 0) unmasked store.
    out_ref[...] = (y + b2_ref[...]).astype(out_ref.dtype)


def fcnet_forward(x, w1, b1, w2, b2, *, block_b=512):
    """Fused FCNet forward.

    x  : (B, In)   float32
    w1 : (In, H)   float32   (transpose of PyTorch fc1.weight)
    b1 : (1, H)    float32
    w2 : (H, Out)  float32   (transpose of PyTorch fc2.weight)
    b2 : (1, Out)  float32
    returns (B, Out) float32
    """
    B, In = x.shape
    In_w, H = w1.shape
    H_w, Out = w2.shape
    assert In_w == In and H_w == H
    assert b1.shape == (1, H)
    assert b2.shape == (1, Out)

    LANE = 128
    SUBLANE = 8

    # ---- Lane-dense output: pad Out up to a multiple of 128 (one-time pad of
    #      w2/b2; padded output columns are sliced off below). ----
    out_p = max(LANE, -(-Out // LANE) * LANE)
    if out_p != Out:
        w2p = jnp.pad(w2, ((0, 0), (0, out_p - Out)))
        b2p = jnp.pad(b2, ((0, 0), (0, out_p - Out)))
    else:
        w2p, b2p = w2, b2

    # ---- Batch tiling: big tiles when B is large, single tile otherwise. ----
    if B <= block_b:
        tb = -(-B // SUBLANE) * SUBLANE          # one tile, sublane-aligned
    else:
        tb = block_b                              # >= 512 rows per tile
    b_p = -(-B // tb) * tb
    xp = jnp.pad(x, ((0, b_p - B), (0, 0))) if b_p != B else x
    n_tiles = b_p // tb

    # Advisory cost hint so XLA schedules neighbors around this kernel.
    flops = 2 * b_p * In * H + 2 * b_p * H * out_p
    bytes_accessed = 4 * (xp.size + w1.size + b1.size + w2p.size + b2p.size
                          + b_p * out_p)
    cost = pl.CostEstimate(flops=flops, transcendentals=0,
                           bytes_accessed=bytes_accessed)

    y_p = pl.pallas_call(
        fcnet_kernel,
        out_shape=jax.ShapeDtypeStruct((b_p, out_p), x.dtype),
        grid_spec=pl.GridSpec(
            grid=(n_tiles,),
            in_specs=[
                # streamed batch tile of activations
                pl.BlockSpec((tb, In), lambda i: (i, 0)),
                # weights / biases: same block every step -> stay resident
                pl.BlockSpec((In, H), lambda i: (0, 0)),
                pl.BlockSpec((1, H), lambda i: (0, 0)),
                pl.BlockSpec((H, out_p), lambda i: (0, 0)),
                pl.BlockSpec((1, out_p), lambda i: (0, 0)),
            ],
            out_specs=pl.BlockSpec((tb, out_p), lambda i: (i, 0)),
        ),
        compiler_params=pltpu.CompilerParams(
            # batch axis is independent -> shard across v7x's 2 TCs
            dimension_semantics=("parallel",),
        ),
        cost_estimate=cost,
    )(xp, w1, b1, w2p, b2p)

    return y_p[:B, :Out]


if __name__ == "__main__":
    # FCNet(input_size, hidden_size, output_size)
    batch = 8
    input_size = 32
    hidden_size = 64
    output_size = 16

    key = jax.random.PRNGKey(0)
    kx, kw1, kb1, kw2, kb2 = jax.random.split(key, 5)

    x = jax.random.normal(kx, (batch, input_size), dtype=jnp.float32)

    # Deterministic parameter init (PyTorch-like uniform bounds 1/sqrt(fan_in)).
    bound1 = 1.0 / jnp.sqrt(input_size)
    w1 = jax.random.uniform(kw1, (input_size, hidden_size),
                            minval=-bound1, maxval=bound1, dtype=jnp.float32)
    b1 = jax.random.uniform(kb1, (1, hidden_size),
                            minval=-bound1, maxval=bound1, dtype=jnp.float32)

    bound2 = 1.0 / jnp.sqrt(hidden_size)
    w2 = jax.random.uniform(kw2, (hidden_size, output_size),
                            minval=-bound2, maxval=bound2, dtype=jnp.float32)
    b2 = jax.random.uniform(kb2, (1, output_size),
                            minval=-bound2, maxval=bound2, dtype=jnp.float32)

    out = fcnet_forward(x, w1, b1, w2, b2)
    out = jax.block_until_ready(out)
    assert out.shape == (batch, output_size)

    # Reference that mirrors the kernel's precision (bf16 operands, fp32 acc).
    h_ref = jnp.maximum(
        jnp.dot(x.astype(jnp.bfloat16), w1.astype(jnp.bfloat16),
                preferred_element_type=jnp.float32) + b1, 0.0)
    ref_bf16 = jnp.dot(h_ref.astype(jnp.bfloat16), w2.astype(jnp.bfloat16),
                       preferred_element_type=jnp.float32) + b2
    assert jnp.allclose(out, ref_bf16, atol=1e-4, rtol=1e-4)

    # Loose sanity check against the full-fp32 math of the PyTorch module.
    ref_f32 = jnp.maximum(x @ w1 + b1, 0.0) @ w2 + b2
    assert jnp.allclose(out, ref_f32, atol=5e-2, rtol=5e-2)

    print("KERNEL_OK")
</pallas_src>

<mosaic_0001>
module attributes {stable_mosaic.version = 11 : i64} {
  func.func @fcnet_kernel(%arg0: i32, %arg1: memref<8x32xf32, #tpu.memory_space<vmem>>, %arg2: memref<32x64xf32, #tpu.memory_space<vmem>>, %arg3: memref<1x64xf32, #tpu.memory_space<vmem>>, %arg4: memref<64x128xf32, #tpu.memory_space<vmem>>, %arg5: memref<1x128xf32, #tpu.memory_space<vmem>>, %arg6: memref<8x128xf32, #tpu.memory_space<vmem>>) attributes {dimension_semantics = [#tpu.dimension_semantics<parallel>], iteration_bounds = array<i64: 1>, scalar_prefetch = 0 : i64, scratch_operands = 0 : i64, tpu.core_type = #tpu.core_type<tc>, window_params = [{transform_indices = @transform_0, window_bounds = array<i64: 8, 32>}, {pipeline_mode = #tpu.pipeline_mode<synchronous>, transform_indices = @transform_1, window_bounds = array<i64: 32, 64>}, {pipeline_mode = #tpu.pipeline_mode<synchronous>, transform_indices = @transform_2, window_bounds = array<i64: 1, 64>}, {pipeline_mode = #tpu.pipeline_mode<synchronous>, transform_indices = @transform_3, window_bounds = array<i64: 64, 128>}, {pipeline_mode = #tpu.pipeline_mode<synchronous>, transform_indices = @transform_4, window_bounds = array<i64: 1, 128>}, {transform_indices = @transform_5, window_bounds = array<i64: 8, 128>}]} {
    %c0 = arith.constant 0 : index
    %c0_0 = arith.constant 0 : index
    %0 = vector.load %arg1[%c0, %c0_0] : memref<8x32xf32, #tpu.memory_space<vmem>>, vector<8x32xf32>
    %1 = arith.truncf %0 : vector<8x32xf32> to vector<8x32xbf16>
    %c0_1 = arith.constant 0 : index
    %c0_2 = arith.constant 0 : index
    %2 = vector.load %arg2[%c0_1, %c0_2] : memref<32x64xf32, #tpu.memory_space<vmem>>, vector<32x64xf32>
    %3 = arith.truncf %2 : vector<32x64xf32> to vector<32x64xbf16>
    %cst = arith.constant dense<0.000000e+00> : vector<8x64xf32>
    %4 = tpu.matmul %1, %3, %cst {dimension_numbers = #tpu.dot_dimension_numbers<[1], [0], [0], [1], [0, 0, 1, 1], [], []>} : vector<8x32xbf16>, vector<32x64xbf16>, vector<8x64xf32> -> vector<8x64xf32>
    %c0_3 = arith.constant 0 : index
    %c0_4 = arith.constant 0 : index
    %5 = vector.load %arg3[%c0_3, %c0_4] : memref<1x64xf32, #tpu.memory_space<vmem>>, vector<1x64xf32>
    %6 = vector.broadcast %5 : vector<1x64xf32> to vector<8x64xf32>
    %7 = arith.addf %4, %6 : vector<8x64xf32>
    %cst_5 = arith.constant 0.000000e+00 : f32
    %8 = vector.broadcast %cst_5 : f32 to vector<8x64xf32>
    %9 = arith.maximumf %7, %8 : vector<8x64xf32>
    %c0_6 = arith.constant 0 : index
    %c0_7 = arith.constant 0 : index
    %10 = vector.load %arg4[%c0_6, %c0_7] : memref<64x128xf32, #tpu.memory_space<vmem>>, vector<64x128xf32>
    %11 = arith.truncf %10 : vector<64x128xf32> to vector<64x128xbf16>
    %12 = arith.truncf %9 : vector<8x64xf32> to vector<8x64xbf16>
    %cst_8 = arith.constant dense<0.000000e+00> : vector<8x128xf32>
    %13 = tpu.matmul %12, %11, %cst_8 {dimension_numbers = #tpu.dot_dimension_numbers<[1], [0], [0], [1], [0, 0, 1, 1], [], []>} : vector<8x64xbf16>, vector<64x128xbf16>, vector<8x128xf32> -> vector<8x128xf32>
    %c0_9 = arith.constant 0 : index
    %c0_10 = arith.constant 0 : index
    %14 = vector.load %arg5[%c0_9, %c0_10] : memref<1x128xf32, #tpu.memory_space<vmem>>, vector<1x128xf32>
    %15 = vector.broadcast %14 : vector<1x128xf32> to vector<8x128xf32>
    %16 = arith.addf %13, %15 : vector<8x128xf32>
    %c0_11 = arith.constant 0 : index
    %c0_12 = arith.constant 0 : index
    %17 = vector.load %arg6[%c0_11, %c0_12] : memref<8x128xf32, #tpu.memory_space<vmem>>, vector<8x128xf32>
    tpu.vector_store %arg6[%c0_11, %c0_12], %16 {strides = array<i32>} : memref<8x128xf32, #tpu.memory_space<vmem>>, vector<8x128xf32>,
    return
  }
  func.func @transform_0(%arg0: i32) -> (i32, i32) {
    %c0_i32 = arith.constant 0 : i32
    %c0_i32_0 = arith.constant 0 : i32
    return %arg0, %c0_i32 : i32, i32
  }
  func.func @transform_1(%arg0: i32) -> (i32, i32) {
    %c0_i32 = arith.constant 0 : i32
    %c0_i32_0 = arith.constant 0 : i32
    %c0_i32_1 = arith.constant 0 : i32
    return %c0_i32, %c0_i32_0 : i32, i32
  }
  func.func @transform_2(%arg0: i32) -> (i32, i32) {
    %c0_i32 = arith.constant 0 : i32
    %c0_i32_0 = arith.constant 0 : i32
    %c0_i32_1 = arith.constant 0 : i32
    return %c0_i32, %c0_i32_0 : i32, i32
  }
  func.func @transform_3(%arg0: i32) -> (i32, i32) {
    %c0_i32 = arith.constant 0 : i32
    %c0_i32_0 = arith.constant 0 : i32
    %c0_i32_1 = arith.constant 0 : i32
    return %c0_i32, %c0_i32_0 : i32, i32
  }
  func.func @transform_4(%arg0: i32) -> (i32, i32) {
    %c0_i32 = arith.constant 0 : i32
    %c0_i32_0 = arith.constant 0 : i32
    %c0_i32_1 = arith.constant 0 : i32
    return %c0_i32, %c0_i32_0 : i32, i32
  }
  func.func @transform_5(%arg0: i32) -> (i32, i32) {
    %c0_i32 = arith.constant 0 : i32
    %c0_i32_0 = arith.constant 0 : i32
    return %arg0, %c0_i32 : i32, i32
  }
}

</mosaic_0001>

<bundles_post_ra>
// kernel: tpu_custom_call.1
= control target key start
LH: loop header
LB: loop body
LE: loop exit
PB: predicated region body
PF: predicated region fallthrough
CT: control target
= control target key end

     0   :  { %10 = vsyncpa [#allocation3], 0  ;;  %s434_s0 = inlined_call_operand.hbm [shape: f32[8,32], index: 0, kind: input, shape index: {}]   ;;  %s435_s1 = inlined_call_operand.hbm [shape: f32[32,64], index: 1, kind: input, shape index: {}]   ;;  %s436_s2 = inlined_call_operand.vmem [shape: f32[1,64], index: 2, kind: input, shape index: {}]   ;;  %s437_s3 = inlined_call_operand.hbm [shape: f32[64,128], index: 3, kind: input, shape index: {}]   ;;  %s438_s4 = inlined_call_operand.vmem [shape: f32[1,128], index: 4, kind: input, shape index: {}]   ;;  %s439_s5 = inlined_call_operand.hbm [shape: f32[8,128], index: 5, kind: output, shape index: {}]  }
   0x1   :  { %11 = vsyncpa [#allocation6], 0 }
   0x2   :  { %12 = vsyncpa [#allocation4], 0  ;;  %s336_s18 = smov [#allocation5]   ;;  %s242_s22 = scalar_lea.hbm %s435_s1, 512 }
   0x3   :  { %s28_s19 = sshll.u32 %s336_s18, 4  ;;  %p243_p0 = scmp.ne.s32.totalorder %s435_s1, %s242_s22  ;;  %s29_s19 = int_to_ptr.vmem [resolvable:$true] %s28_s19 }
   0x4   :  { %p246_p1 = scmp.lt.u32.totalorder %s242_s22, %s435_s1 }
   0x6   :  { %p248_p2 = pnand %p246_p1, %p243_p0 }
   0x8   :  { %251 = shalt.err (!%p248_p2)
}
   0x9   :  { %s252_s27 = scalar_lea.vmem %s29_s19, 512  ;;  %p257_p4 = scmp.lt.s32.totalorder %s29_s19, %s29_s19 }
   0xa   :  { %p253_p3 = scmp.ne.s32.totalorder %s29_s19, %s252_s27  ;;  %p258_p5 = scmp.lt.s32.totalorder %s252_s27, %s252_s27 }
   0xc   :  { %p259_p6 = por %p258_p5, %p257_p4 }
   0xe   :  { %p260_p7 = pnand %p259_p6, %p253_p3 }
  0x10   :  { %263 = shalt.err (!%p260_p7)
}
  0x11   :  { %s337_s28 = smov 128   ;;  %s338_s29 = smov 8  }
  0x12   :  { %34 = dma.hbm_to_vmem [thread:$0]  %s435_s1, 512, %s29_s19, [#allocation6], %s337_s28, %s337_s28, %s338_s29  }
  0x13   :  { %s339_s7 = smov [#allocation2]   ;;  %s340_s9 = smov [#allocation7]  }
  0x14   :  { %s19_s8 = sshll.u32 %s339_s7, 4  ;;  %s42_s10 = sshll.u32 %s340_s9, 4  ;;  %s20_s8 = int_to_ptr.vmem [resolvable:$true] %s19_s8  ;;  %s43_s10 = int_to_ptr.vmem [resolvable:$true] %s42_s10 }
  0x15   :  { %s264_s13 = scalar_lea.hbm %s434_s0, 128 }
  0x16   :  { %p265_p8 = scmp.ne.s32.totalorder %s434_s0, %s264_s13  ;;  %p268_p9 = scmp.lt.u32.totalorder %s264_s13, %s434_s0 }
  0x18   :  { %p270_p10 = pnand %p268_p9, %p265_p8 }
  0x1a   :  { %273 = shalt.err (!%p270_p10)
}
  0x1b   :  { %s274_s1 = scalar_lea.vmem %s20_s8, 128  ;;  %p279_p12 = scmp.lt.s32.totalorder %s20_s8, %s20_s8 }
  0x1c   :  { %p275_p11 = scmp.ne.s32.totalorder %s20_s8, %s274_s1  ;;  %p280_p13 = scmp.lt.s32.totalorder %s274_s1, %s274_s1 }
  0x1e   :  { %p281_p0 = por %p280_p13, %p279_p12 }
  0x20   :  { %p282_p1 = pnand %p281_p0, %p275_p11 }
  0x22   :  { %285 = shalt.err (!%p282_p1)
}
  0x23   :  { %22 = dma.hbm_to_vmem [thread:$0]  %s434_s0, 128, %s20_s8, [#allocation3]  }
  0x24   :  { %s286_s22 = scalar_lea.hbm %s437_s3, 1024 }
  0x25   :  { %p287_p2 = scmp.ne.s32.totalorder %s437_s3, %s286_s22  ;;  %p290_p3 = scmp.lt.u32.totalorder %s286_s22, %s437_s3 }
  0x27   :  { %p292_p4 = pnand %p290_p3, %p287_p2 }
  0x29   :  { %295 = shalt.err (!%p292_p4)
}
  0x2a   :  { %s296_s27 = scalar_lea.vmem %s43_s10, 1024  ;;  %p301_p6 = scmp.lt.s32.totalorder %s43_s10, %s43_s10 }
  0x2b   :  { %p297_p5 = scmp.ne.s32.totalorder %s43_s10, %s296_s27  ;;  %p302_p7 = scmp.lt.s32.totalorder %s296_s27, %s296_s27 }
  0x2d   :  { %p303_p8 = por %p302_p7, %p301_p6 }
  0x2f   :  { %p304_p9 = pnand %p303_p8, %p297_p5 }
  0x31   :  { %307 = shalt.err (!%p304_p9)
}
  0x32   :  { %48 = dma.hbm_to_vmem [thread:$0]  %s437_s3, 1024, %s43_s10, [#allocation6], %s337_s28, %s337_s28, %s338_s29  }
  0x33   :  { %330 = dma.done.wait [#allocation3], 128  }
  0x34   :  { %331 = vsyncadd [#allocation3], 4294967168 }
  0x35   :  { %332 = dma.done.wait [#allocation6], 1536  }
  0x36   :  { %333 = vsyncadd [#allocation6], 4294965760  ;;  %v341_v0 = vmov 0.0   ;;  %vm342_vm0 = vmmov 0   ;;  %v63_v1 = vld [vmem:[#allocation5] sm:$0xff]  ;;  %v64_v2 = vld [vmem:[#allocation5 + $0x8] sm:$0xff] }
  0x37   :  { %214 = vmatprep.subr.bf16.mxu0 %v341_v0  ;;  %218 = vmatprep.mubr.msk.bf16.mxu0 %vm342_vm0, %v341_v0  ;;  %v65_v3 = vld [vmem:[#allocation5 + $0x10] sm:$0xff]  ;;  %v67_v4 = vpack.c.bf16 %v64_v2, %v63_v1  ;;  %v66_v5 = vld [vmem:[#allocation5 + $0x18] sm:$0xff]  ;;  %v121_v6 = vld [vmem:[#allocation7] sm:$0xff]  ;;  %vm76_vm1 = vcmask 261120   ;;  %vm141_vm2 = vcmask 523264   ;;  %s343_s7 = smov [#allocation8]  }
  0x38   :  { %222 = vmatprep.subr.bf16.mxu1 %v341_v0  ;;  %230 = vmatprep.mubr.msk.bf16.mxu1 %vm342_vm0, %v341_v0  ;;  %v122_v7 = vld [vmem:[#allocation7 + $0x8] sm:$0xff]  ;;  %v123_v8 = vld [vmem:[#allocation7 + $0x10] sm:$0xff]  ;;  %v124_v9 = vld [vmem:[#allocation7 + $0x18] sm:$0xff]  ;;  %v68_v10 = vpack.c.bf16 %v66_v5, %v65_v3  ;;  %s192_s8 = sshll.u32 %s343_s7, 4  ;;  %s193_s8 = int_to_ptr.vmem [resolvable:$true] %s192_s8 }
  0x39   :  { %215 = vmatpush3.bf16.msra.mxu0 %v67_v4  ;;  %v61_v11 = vld [vmem:[#allocation2] sm:$0xff]  ;;  %v129_v12 = vpack.c.bf16 %v122_v7, %v121_v6  ;;  %v130_v13 = vpack.c.bf16 %v124_v9, %v123_v8  ;;  %v125_v15 = vld [vmem:[#allocation7 + $0x20] sm:$0xff]  ;;  %v126_v16 = vld [vmem:[#allocation7 + $0x28] sm:$0xff]  ;;  %p313_p11 = scmp.lt.s32.totalorder %s193_s8, %s193_s8 }
  0x3a   :  { %216 = vmatprep.subr.bf16.mxu0 %v341_v0  ;;  %v62_v14 = vpack.c.bf16 %v61_v11, %v61_v11  ;;  %v131_v17 = vpack.c.bf16 %v126_v16, %v125_v15  ;;  %v127_v18 = vld [vmem:[#allocation7 + $0x30] sm:$0xff]  ;;  %v128_v19 = vld [vmem:[#allocation7 + $0x38] sm:$0xff] }
  0x3b   :  { %223 = vmatpush3.bf16.msra.mxu1 %v129_v12  ;;  %v132_v20 = vpack.c.bf16 %v128_v19, %v127_v18  ;;  %v202_v21 = vld [vmem:[%s436_s2] ss:$0 sm:$0xff]  ;;  %s308_s2 = scalar_lea.vmem %s193_s8, 128 }
  0x3c   :  { %224 = vmatprep.subr.bf16.mxu1 %v341_v0  ;;  %v204_v29 = vld [vmem:[%s438_s4] ss:$0 sm:$0xff]  ;;  %p309_p10 = scmp.ne.s32.totalorder %s193_s8, %s308_s2  ;;  %p314_p12 = scmp.lt.s32.totalorder %s308_s2, %s308_s2 }
  0x3d   :  { %217 = vmatpush3.bf16.msra.mxu0 %v68_v10 }
  0x3e   :  { %p315_p13 = por %p314_p12, %p313_p11 }
  0x3f   :  { %225 = vmatpush3.bf16.msra.mxu1 %v130_v13 }
  0x40   :  { %219 = vmatmul.mubr.msk.bf16.vlgmr.msra.gmra.mrb[0].mxu0 %vm76_vm1, %v62_v14  ;;  %226 = vmatprep.subr.bf16.mxu1 %v341_v0  ;;  %p316_p0 = pnand %p315_p13, %p309_p10 }
  0x43   :  { %227 = vmatpush3.bf16.msra.mxu1 %v131_v17 }
  0x44   :  { %228 = vmatprep.subr.bf16.mxu1 %v341_v0 }
  0x47   :  { %229 = vmatpush3.bf16.msra.mxu1 %v132_v20 }
 0x113   :  { %v114_v22 = vpop.f32.mrb[0].mxu0 }
 0x114   :  { %v115_v23 = vadd.f32 %v202_v21, %v114_v22  ;;  %v220_v24 = vpop.f32.mrb[1].mxu0 }
 0x115   :  { %v117_v25 = vpop.f32.mrb[2].mxu0 }
 0x116   :  { %v120_v26 = vmax.f32 %v115_v23, 0.0  ;;  %v221_v27 = vpop.f32.mrb[3].mxu0 }
 0x118   :  { %v133_v28 = vpack.c.bf16 %v120_v26, %v120_v26 }
 0x11a   :  { %231 = vmatmul.mubr.msk.bf16.vlgmr.msra.gmra.mrb[0].mxu1 %vm141_vm2, %v133_v28 }
 0x1ed   :  { %v179_v30 = vpop.f32.mrb[0].mxu1 }
 0x1ee   :  { %v180_v31 = vadd.f32 %v204_v29, %v179_v30  ;;  %v232_v32 = vpop.f32.mrb[1].mxu1 }
 0x1ef   :  { %v182_v33 = vpop.f32.mrb[2].mxu1 }
 0x1f0   :  { %185 = vst [vmem:[#allocation8] sm:$0xff] %v180_v31  ;;  %v233_v34 = vpop.f32.mrb[3].mxu1 }
 0x1f1   :  { %319 = shalt.err (!%p316_p0)
}
 0x1f2   :  { %s320_s4 = scalar_lea.hbm %s439_s5, 128 }
 0x1f3   :  { %p321_p1 = scmp.ne.s32.totalorder %s439_s5, %s320_s4  ;;  %p324_p2 = scmp.lt.u32.totalorder %s320_s4, %s439_s5 }
 0x1f5   :  { %p326_p3 = pnand %p324_p2, %p321_p1 }
 0x1f7   :  { %329 = shalt.err (!%p326_p3)
}
 0x1f8   :  { %195 = dma.vmem_to_hbm [thread:$0]  %s193_s8, 128, %s439_s5, [#allocation4]  }
 0x1f9   :  { %334 = dma.done.wait [#allocation4], 128  }
 0x1fa   :  { %335 = vsyncadd [#allocation4], 4294967168 }
 0x1fb   :  { %199 = vsyncpa [#allocation3], 1 }
 0x1fc   :  { %200 = vsyncpa [#allocation6], 1 }
 0x1fd   :  { %201 = vsyncpa [#allocation4], 1 }

</bundles_post_ra>
